<compile_context>
chip_gen: v7x
topology: tpu7x:2x2x1
jax: 0.10.0
libtpu: 0.0.40
codegen_flags: <defaults>
</compile_context>

<pallas_src>
import functools
import math

import jax
import jax.numpy as jnp
from jax.experimental import pallas as pl
from jax.experimental.pallas import tpu as pltpu


def _mha_kernel(q_ref, k_ref, v_ref, wqkv_ref, wo_ref, bqkv_ref, bo_ref,  # inputs
                out_ref, attn_ref,                                        # outputs
                *scratch,                                                 # acc (opt.)
                hpg, d_k, n_hg, compute_dtype, approx_recip):
    """Grid = (batch, head_group). One step: every head of one group, one batch."""
    g = pl.program_id(1)
    cd = compute_dtype
    seq = q_ref.shape[1]

    xq = q_ref[0]                                   # (seq, d_model) compute dtype
    xk = k_ref[0]
    xv = v_ref[0]

    # Lane-dense projections for this head group: (seq, d_model) @ (d_model, gw),
    # f32 accumulation.  1/sqrt(d_k) is folded into wqkv_ref[0]/bqkv_ref[0] (Q).
    qp = jnp.dot(xq, wqkv_ref[0], preferred_element_type=jnp.float32) + bqkv_ref[0:1, :]
    kp = jnp.dot(xk, wqkv_ref[1], preferred_element_type=jnp.float32) + bqkv_ref[1:2, :]
    vp = jnp.dot(xv, wqkv_ref[2], preferred_element_type=jnp.float32) + bqkv_ref[2:3, :]

    # Head-major relayout ONCE (no per-head lane slicing), then one cast to the
    # matmul dtype.
    qh = jnp.transpose(qp.reshape(seq, hpg, d_k), (1, 0, 2)).astype(cd)  # (hpg, seq, d_k)
    kh = jnp.transpose(kp.reshape(seq, hpg, d_k), (1, 0, 2)).astype(cd)
    vh = jnp.transpose(vp.reshape(seq, hpg, d_k), (1, 0, 2)).astype(cd)

    # Batched QK^T over the leading (sublane-major) head axis; no K transpose.
    scores = jnp.einsum("hqd,hkd->hqk", qh, kh,
                        preferred_element_type=jnp.float32)      # (hpg, seq, seq)
    scores = scores - jnp.max(scores, axis=-1, keepdims=True)
    e = jnp.exp(scores)
    inv = pl.reciprocal(jnp.sum(e, axis=-1, keepdims=True), approx=approx_recip)
    attn = e * inv                                               # f32 probs
    attn_ref[0] = attn.astype(attn_ref.dtype)

    ctx = jnp.einsum("hqk,hkd->hqd", attn.astype(cd), vh,
                     preferred_element_type=jnp.float32)         # (hpg, seq, d_k)

    # Output projection for this group: sum_h ctx_h @ Wo[h*d_k:(h+1)*d_k, :]
    # (sublane-sliced Wo rows, lane-dense N = d_model, no ctx scratch buffer).
    partial = jnp.dot(ctx[0].astype(cd), wo_ref[0:d_k, :],
                      preferred_element_type=jnp.float32)
    for h in range(1, hpg):
        partial = partial + jnp.dot(ctx[h].astype(cd),
                                    wo_ref[h * d_k:(h + 1) * d_k, :],
                                    preferred_element_type=jnp.float32)

    if n_hg == 1:
        # Single head group: write the output once, lane-dense, no accumulator.
        out_ref[0] = (partial + bo_ref[...]).astype(out_ref.dtype)
    else:
        acc_ref = scratch[0]

        @pl.when(g == 0)
        def _():
            acc_ref[...] = jnp.zeros_like(acc_ref)

        acc_ref[...] += partial

        @pl.when(g == n_hg - 1)
        def _():
            out_ref[0] = (acc_ref[...] + bo_ref[...]).astype(out_ref.dtype)


def _vmem_capacity_bytes():
    try:
        return int(pltpu.get_tpu_info().vmem_capacity_bytes)
    except Exception:
        return 64 * 1024 * 1024   # smallest per-core VMEM across v5e/v6e/v7x


def multi_head_attention(q, k, v, params, heads, *,
                         compute_dtype=jnp.bfloat16,
                         attn_dtype=jnp.float32,
                         approx_recip=True,
                         mask=None):
    """Pallas implementation of MultiHeadAttention.forward (mask=None)."""
    if mask is not None:
        # TODO(synk): mask support (mask is None in this synthetic setup).
        raise NotImplementedError("mask is not supported")

    wq, bq, wk, bk, wv, bv, wo, bo = params
    bs, seq, d_model = q.shape
    assert d_model % heads == 0
    d_k = d_model // heads
    scale = 1.0 / math.sqrt(d_k)

    cd_bytes = jnp.dtype(compute_dtype).itemsize
    out_bytes = jnp.dtype(q.dtype).itemsize
    attn_bytes = jnp.dtype(attn_dtype).itemsize

    # --- VMEM plan -------------------------------------------------------------
    # Generation-aware budget (v7x: 64 MiB physical per TC; v5e/v6e: 128 MiB).
    budget = int(0.85 * _vmem_capacity_bytes())

    def footprint(hpg):
        gw = hpg * d_k
        n_hg = heads // hpg
        wbuf = 1 if n_hg == 1 else 2            # constant index_map -> 1 buffer
        return (3 * 2 * seq * d_model * cd_bytes        # q/k/v blocks (x2 buffers)
                + wbuf * 3 * d_model * gw * cd_bytes    # Wq/Wk/Wv group slices
                + wbuf * gw * d_model * cd_bytes        # Wo group slice
                + wbuf * 3 * max(gw, 128) * 4           # bq/bk/bv
                + max(d_model, 128) * 4                 # bo
                + 2 * seq * d_model * out_bytes         # output block (x2 buffers)
                + 2 * hpg * seq * seq * attn_bytes      # probs block (x2 buffers)
                + (seq * d_model * 4 if n_hg > 1 else 0))  # f32 out accumulator

    # Head-group width must keep every BlockSpec lane-dense (multiple of 128)
    # unless it spans all heads (full-extent blocks are always legal).
    candidates = [h for h in range(heads, 0, -1)
                  if heads % h == 0 and (h == heads or (h * d_k) % 128 == 0)]
    hpg = next((h for h in candidates if footprint(h) <= budget), candidates[-1])
    n_hg = heads // hpg
    gw = hpg * d_k
    fp = footprint(hpg)
    vmem_limit = int(min(budget, max(fp * 13 // 10, 8 * 1024 * 1024)))

    # --- glue (plain JAX): fold 1/sqrt(d_k) into Q, stack weights/biases --------
    w_qkv = jnp.stack([wq * scale, wk, wv]).astype(compute_dtype)   # (3, dm, dm)
    w_o = wo.astype(compute_dtype)                                  # (dm, dm)
    b_qkv = jnp.stack([bq * scale, bk, bv]).astype(jnp.float32)     # (3, dm)
    b_o = bo.reshape(1, d_model).astype(jnp.float32)                # (1, dm)

    qc = q.astype(compute_dtype)
    kc = k.astype(compute_dtype)
    vc = v.astype(compute_dtype)

    kernel = functools.partial(_mha_kernel, hpg=hpg, d_k=d_k, n_hg=n_hg,
                               compute_dtype=compute_dtype,
                               approx_recip=approx_recip)

    single = (n_hg == 1)

    def spec(shape, imap, single_buffer):
        if single_buffer:
            # Constant index_map: fetched once, keep a single resident buffer.
            return pl.BlockSpec(shape, imap, pipeline_mode=pl.Buffered(1))
        return pl.BlockSpec(shape, imap)

    out, w = pl.pallas_call(
        kernel,
        out_shape=(
            jax.ShapeDtypeStruct((bs, seq, d_model), q.dtype),
            jax.ShapeDtypeStruct((bs, heads, seq, seq), attn_dtype),
        ),
        grid=(bs, n_hg),
        in_specs=[
            pl.BlockSpec((1, seq, d_model), lambda b, g: (b, 0, 0)),     # q
            pl.BlockSpec((1, seq, d_model), lambda b, g: (b, 0, 0)),     # k
            pl.BlockSpec((1, seq, d_model), lambda b, g: (b, 0, 0)),     # v
            spec((3, d_model, gw), lambda b, g: (0, 0, g), single),      # Wq,Wk,Wv
            spec((gw, d_model), lambda b, g: (g, 0), single),            # Wo
            spec((3, gw), lambda b, g: (0, g), single),                  # bq,bk,bv
            spec((1, d_model), lambda b, g: (0, 0), True),               # bo
        ],
        out_specs=(
            pl.BlockSpec((1, seq, d_model), lambda b, g: (b, 0, 0)),     # output
            pl.BlockSpec((1, hpg, seq, seq), lambda b, g: (b, g, 0, 0)), # attn probs
        ),
        scratch_shapes=([] if single
                        else [pltpu.VMEM((seq, d_model), jnp.float32)]),
        compiler_params=pltpu.CompilerParams(
            # batch axis -> parallel (megacore / v7x two TCs); the head-group
            # axis is a reduction for the output projection, so "arbitrary".
            dimension_semantics=("parallel", "arbitrary"),
            vmem_limit_bytes=vmem_limit,
        ),
    )(qc, kc, vc, w_qkv, w_o, b_qkv, b_o)

    return out, w


def ref_multi_head_attention(q, k, v, params, heads):
    """Pure-JAX reference matching the PyTorch forward exactly."""
    wq, bq, wk, bk, wv, bv, wo, bo = params
    bs, seq, d_model = q.shape
    d_k = d_model // heads
    qp = (q @ wq + bq).reshape(bs, seq, heads, d_k).transpose(0, 2, 1, 3)
    kp = (k @ wk + bk).reshape(bs, seq, heads, d_k).transpose(0, 2, 1, 3)
    vp = (v @ wv + bv).reshape(bs, seq, heads, d_k).transpose(0, 2, 1, 3)
    scores = jnp.einsum("bhqd,bhkd->bhqk", qp, kp) / math.sqrt(d_k)
    w = jax.nn.softmax(scores, axis=-1)
    ctx = (jnp.einsum("bhqk,bhkd->bhqd", w, vp)
           .transpose(0, 2, 1, 3).reshape(bs, seq, d_model))
    out = ctx @ wo + bo
    return out, w


if __name__ == "__main__":
    bs, seq, d_model, heads = 2, 8, 32, 4

    key = jax.random.PRNGKey(0)
    keys = jax.random.split(key, 11)
    q = jax.random.normal(keys[0], (bs, seq, d_model), dtype=jnp.float32)
    k = jax.random.normal(keys[1], (bs, seq, d_model), dtype=jnp.float32)
    v = jax.random.normal(keys[2], (bs, seq, d_model), dtype=jnp.float32)

    s = 1.0 / math.sqrt(d_model)
    params = (
        jax.random.normal(keys[3], (d_model, d_model), jnp.float32) * s,   # Wq^T
        jax.random.normal(keys[4], (d_model,), jnp.float32) * s,           # bq
        jax.random.normal(keys[5], (d_model, d_model), jnp.float32) * s,   # Wk^T
        jax.random.normal(keys[6], (d_model,), jnp.float32) * s,           # bk
        jax.random.normal(keys[7], (d_model, d_model), jnp.float32) * s,   # Wv^T
        jax.random.normal(keys[8], (d_model,), jnp.float32) * s,           # bv
        jax.random.normal(keys[9], (d_model, d_model), jnp.float32) * s,   # Wo^T
        jax.random.normal(keys[10], (d_model,), jnp.float32) * s,          # bo
    )

    out_r, w_r = ref_multi_head_attention(q, k, v, params, heads)

    # 1) Validation path: f32 matmul operands + exact reciprocal, tight tolerance.
    out, w = multi_head_attention(q, k, v, params, heads,
                                  compute_dtype=jnp.float32, approx_recip=False)
    out, w = jax.block_until_ready((out, w))
    assert out.shape == (bs, seq, d_model)
    assert w.shape == (bs, heads, seq, seq)
    assert jnp.allclose(out, out_r, atol=1e-4, rtol=1e-4)
    assert jnp.allclose(w, w_r, atol=1e-4, rtol=1e-4)

    # 2) Default production path: bf16 matmul operands (f32 accumulate/softmax),
    #    approximate EUP reciprocal.  Relaxed tolerance vs the f32 reference.
    out_bf, w_bf = multi_head_attention(q, k, v, params, heads)
    out_bf, w_bf = jax.block_until_ready((out_bf, w_bf))
    assert jnp.allclose(out_bf, out_r, atol=2e-1, rtol=1e-1)
    assert jnp.allclose(w_bf, w_r, atol=1e-1, rtol=1e-1)

    print("KERNEL_OK")
</pallas_src>

<mosaic_0001>
module attributes {stable_mosaic.version = 11 : i64} {
  func.func @_mha_kernel(%arg0: i32, %arg1: i32, %arg2: memref<1x8x32xf32, #tpu.memory_space<vmem>>, %arg3: memref<1x8x32xf32, #tpu.memory_space<vmem>>, %arg4: memref<1x8x32xf32, #tpu.memory_space<vmem>>, %arg5: memref<3x32x32xf32, #tpu.memory_space<vmem>>, %arg6: memref<32x32xf32, #tpu.memory_space<vmem>>, %arg7: memref<3x32xf32, #tpu.memory_space<vmem>>, %arg8: memref<1x32xf32, #tpu.memory_space<vmem>>, %arg9: memref<1x8x32xf32, #tpu.memory_space<vmem>>, %arg10: memref<1x4x8x8xf32, #tpu.memory_space<vmem>>) attributes {dimension_semantics = [#tpu.dimension_semantics<parallel>, #tpu.dimension_semantics<arbitrary>], iteration_bounds = array<i64: 2, 1>, scalar_prefetch = 0 : i64, scratch_operands = 0 : i64, tpu.core_type = #tpu.core_type<tc>, window_params = [{transform_indices = @transform_0, window_bounds = array<i64: 1, 8, 32>}, {transform_indices = @transform_1, window_bounds = array<i64: 1, 8, 32>}, {transform_indices = @transform_2, window_bounds = array<i64: 1, 8, 32>}, {pipeline_mode = #tpu.pipeline_mode<synchronous>, transform_indices = @transform_3, window_bounds = array<i64: 3, 32, 32>}, {pipeline_mode = #tpu.pipeline_mode<synchronous>, transform_indices = @transform_4, window_bounds = array<i64: 32, 32>}, {pipeline_mode = #tpu.pipeline_mode<synchronous>, transform_indices = @transform_5, window_bounds = array<i64: 3, 32>}, {pipeline_mode = #tpu.pipeline_mode<synchronous>, transform_indices = @transform_6, window_bounds = array<i64: 1, 32>}, {transform_indices = @transform_7, window_bounds = array<i64: 1, 8, 32>}, {transform_indices = @transform_8, window_bounds = array<i64: 1, 4, 8, 8>}]} {
    %c0 = arith.constant 0 : index
    %c0_0 = arith.constant 0 : index
    %c0_1 = arith.constant 0 : index
    %0 = vector.load %arg2[%c0, %c0_0, %c0_1] : memref<1x8x32xf32, #tpu.memory_space<vmem>>, vector<1x8x32xf32>
    %1 = vector.shape_cast %0 : vector<1x8x32xf32> to vector<8x32xf32>
    %c0_2 = arith.constant 0 : index
    %c0_3 = arith.constant 0 : index
    %c0_4 = arith.constant 0 : index
    %2 = vector.load %arg3[%c0_2, %c0_3, %c0_4] : memref<1x8x32xf32, #tpu.memory_space<vmem>>, vector<1x8x32xf32>
    %3 = vector.shape_cast %2 : vector<1x8x32xf32> to vector<8x32xf32>
    %c0_5 = arith.constant 0 : index
    %c0_6 = arith.constant 0 : index
    %c0_7 = arith.constant 0 : index
    %4 = vector.load %arg4[%c0_5, %c0_6, %c0_7] : memref<1x8x32xf32, #tpu.memory_space<vmem>>, vector<1x8x32xf32>
    %5 = vector.shape_cast %4 : vector<1x8x32xf32> to vector<8x32xf32>
    %c0_8 = arith.constant 0 : index
    %c0_9 = arith.constant 0 : index
    %c0_10 = arith.constant 0 : index
    %6 = vector.load %arg5[%c0_8, %c0_9, %c0_10] : memref<3x32x32xf32, #tpu.memory_space<vmem>>, vector<1x32x32xf32>
    %7 = vector.shape_cast %6 : vector<1x32x32xf32> to vector<32x32xf32>
    %cst = arith.constant dense<0.000000e+00> : vector<8x32xf32>
    %8 = tpu.matmul %1, %7, %cst {dimension_numbers = #tpu.dot_dimension_numbers<[1], [0], [0], [1], [0, 0, 1, 1], [], []>} : vector<8x32xf32>, vector<32x32xf32>, vector<8x32xf32> -> vector<8x32xf32>
    %c0_11 = arith.constant 0 : index
    %c0_12 = arith.constant 0 : index
    %9 = vector.load %arg7[%c0_11, %c0_12] : memref<3x32xf32, #tpu.memory_space<vmem>>, vector<1x32xf32>
    %10 = vector.broadcast %9 : vector<1x32xf32> to vector<8x32xf32>
    %11 = arith.addf %8, %10 : vector<8x32xf32>
    %c1 = arith.constant 1 : index
    %c0_13 = arith.constant 0 : index
    %c0_14 = arith.constant 0 : index
    %12 = vector.load %arg5[%c1, %c0_13, %c0_14] : memref<3x32x32xf32, #tpu.memory_space<vmem>>, vector<1x32x32xf32>
    %13 = vector.shape_cast %12 : vector<1x32x32xf32> to vector<32x32xf32>
    %cst_15 = arith.constant dense<0.000000e+00> : vector<8x32xf32>
    %14 = tpu.matmul %3, %13, %cst_15 {dimension_numbers = #tpu.dot_dimension_numbers<[1], [0], [0], [1], [0, 0, 1, 1], [], []>} : vector<8x32xf32>, vector<32x32xf32>, vector<8x32xf32> -> vector<8x32xf32>
    %c1_16 = arith.constant 1 : index
    %c0_17 = arith.constant 0 : index
    %15 = vector.load %arg7[%c1_16, %c0_17] : memref<3x32xf32, #tpu.memory_space<vmem>>, vector<1x32xf32>
    %16 = vector.broadcast %15 : vector<1x32xf32> to vector<8x32xf32>
    %17 = arith.addf %14, %16 : vector<8x32xf32>
    %c2 = arith.constant 2 : index
    %c0_18 = arith.constant 0 : index
    %c0_19 = arith.constant 0 : index
    %18 = vector.load %arg5[%c2, %c0_18, %c0_19] : memref<3x32x32xf32, #tpu.memory_space<vmem>>, vector<1x32x32xf32>
    %19 = vector.shape_cast %18 : vector<1x32x32xf32> to vector<32x32xf32>
    %cst_20 = arith.constant dense<0.000000e+00> : vector<8x32xf32>
    %20 = tpu.matmul %5, %19, %cst_20 {dimension_numbers = #tpu.dot_dimension_numbers<[1], [0], [0], [1], [0, 0, 1, 1], [], []>} : vector<8x32xf32>, vector<32x32xf32>, vector<8x32xf32> -> vector<8x32xf32>
    %c2_21 = arith.constant 2 : index
    %c0_22 = arith.constant 0 : index
    %21 = vector.load %arg7[%c2_21, %c0_22] : memref<3x32xf32, #tpu.memory_space<vmem>>, vector<1x32xf32>
    %22 = vector.broadcast %21 : vector<1x32xf32> to vector<8x32xf32>
    %23 = arith.addf %20, %22 : vector<8x32xf32>
    %24 = vector.shape_cast %11 : vector<8x32xf32> to vector<8x4x8xf32>
    %25 = tpu.transpose %24, [1, 0, 2] : vector<8x4x8xf32> -> vector<4x8x8xf32>
    %26 = vector.shape_cast %17 : vector<8x32xf32> to vector<8x4x8xf32>
    %27 = tpu.transpose %26, [1, 0, 2] : vector<8x4x8xf32> -> vector<4x8x8xf32>
    %28 = vector.shape_cast %23 : vector<8x32xf32> to vector<8x4x8xf32>
    %29 = tpu.transpose %28, [1, 0, 2] : vector<8x4x8xf32> -> vector<4x8x8xf32>
    "tpu.trace_start"() <{level = 10 : i32, message = "hqd,hkd->hqk"}> : () -> ()
    %cst_23 = arith.constant dense<0.000000e+00> : vector<4x8x8xf32>
    %30 = tpu.matmul %25, %27, %cst_23 {dimension_numbers = #tpu.dot_dimension_numbers<[2], [2], [1], [1], [0, 0, 0, 1, 1, 1], [0], [0]>} : vector<4x8x8xf32>, vector<4x8x8xf32>, vector<4x8x8xf32> -> vector<4x8x8xf32>
    "tpu.trace_stop"() : () -> ()
    %cst_24 = arith.constant dense<0xFF800000> : vector<4x8xf32>
    %31 = vector.multi_reduction <maximumf>, %30, %cst_24 [2] : vector<4x8x8xf32> to vector<4x8xf32>
    %32 = vector.shape_cast %31 : vector<4x8xf32> to vector<4x8x1xf32>
    %33 = vector.broadcast %32 : vector<4x8x1xf32> to vector<4x8x8xf32>
    %34 = arith.subf %30, %33 : vector<4x8x8xf32>
    %35 = math.exp %34 : vector<4x8x8xf32>
    %cst_25 = arith.constant dense<0.000000e+00> : vector<4x8xf32>
    %36 = vector.multi_reduction <add>, %35, %cst_25 [2] : vector<4x8x8xf32> to vector<4x8xf32>
    %37 = vector.shape_cast %36 : vector<4x8xf32> to vector<4x8x1xf32>
    %38 = tpu.reciprocal %37 : vector<4x8x1xf32> -> vector<4x8x1xf32>
    %39 = vector.broadcast %38 : vector<4x8x1xf32> to vector<4x8x8xf32>
    %40 = arith.mulf %35, %39 : vector<4x8x8xf32>
    %c0_26 = arith.constant 0 : index
    %c0_27 = arith.constant 0 : index
    %c0_28 = arith.constant 0 : index
    %c0_29 = arith.constant 0 : index
    %41 = vector.load %arg10[%c0_26, %c0_27, %c0_28, %c0_29] : memref<1x4x8x8xf32, #tpu.memory_space<vmem>>, vector<1x4x8x8xf32>
    %42 = vector.shape_cast %41 : vector<1x4x8x8xf32> to vector<4x8x8xf32>
    %43 = vector.shape_cast %40 : vector<4x8x8xf32> to vector<1x4x8x8xf32>
    tpu.vector_store %arg10[%c0_26, %c0_27, %c0_28, %c0_29], %43 {strides = array<i32>} : memref<1x4x8x8xf32, #tpu.memory_space<vmem>>, vector<1x4x8x8xf32>,
    "tpu.trace_start"() <{level = 10 : i32, message = "hqk,hkd->hqd"}> : () -> ()
    %cst_30 = arith.constant dense<0.000000e+00> : vector<4x8x8xf32>
    %44 = tpu.matmul %40, %29, %cst_30 {dimension_numbers = #tpu.dot_dimension_numbers<[2], [1], [1], [2], [0, 0, 0, 1, 1, 2], [0], [0]>} : vector<4x8x8xf32>, vector<4x8x8xf32>, vector<4x8x8xf32> -> vector<4x8x8xf32>
    "tpu.trace_stop"() : () -> ()
    %45 = vector.extract_strided_slice %44 {offsets = [0, 0, 0], sizes = [1, 8, 8], strides = [1, 1, 1]} : vector<4x8x8xf32> to vector<1x8x8xf32>
    %46 = vector.shape_cast %45 : vector<1x8x8xf32> to vector<8x8xf32>
    %c0_31 = arith.constant 0 : index
    %c0_32 = arith.constant 0 : index
    %47 = vector.load %arg6[%c0_31, %c0_32] : memref<32x32xf32, #tpu.memory_space<vmem>>, vector<8x32xf32>
    %cst_33 = arith.constant dense<0.000000e+00> : vector<8x32xf32>
    %48 = tpu.matmul %46, %47, %cst_33 {dimension_numbers = #tpu.dot_dimension_numbers<[1], [0], [0], [1], [0, 0, 1, 1], [], []>} : vector<8x8xf32>, vector<8x32xf32>, vector<8x32xf32> -> vector<8x32xf32>
    %49 = vector.extract_strided_slice %44 {offsets = [1, 0, 0], sizes = [1, 8, 8], strides = [1, 1, 1]} : vector<4x8x8xf32> to vector<1x8x8xf32>
    %50 = vector.shape_cast %49 : vector<1x8x8xf32> to vector<8x8xf32>
    %c8 = arith.constant 8 : index
    %c0_34 = arith.constant 0 : index
    %51 = vector.load %arg6[%c8, %c0_34] : memref<32x32xf32, #tpu.memory_space<vmem>>, vector<8x32xf32>
    %cst_35 = arith.constant dense<0.000000e+00> : vector<8x32xf32>
    %52 = tpu.matmul %50, %51, %cst_35 {dimension_numbers = #tpu.dot_dimension_numbers<[1], [0], [0], [1], [0, 0, 1, 1], [], []>} : vector<8x8xf32>, vector<8x32xf32>, vector<8x32xf32> -> vector<8x32xf32>
    %53 = arith.addf %48, %52 : vector<8x32xf32>
    %54 = vector.extract_strided_slice %44 {offsets = [2, 0, 0], sizes = [1, 8, 8], strides = [1, 1, 1]} : vector<4x8x8xf32> to vector<1x8x8xf32>
    %55 = vector.shape_cast %54 : vector<1x8x8xf32> to vector<8x8xf32>
    %c16 = arith.constant 16 : index
    %c0_36 = arith.constant 0 : index
    %56 = vector.load %arg6[%c16, %c0_36] : memref<32x32xf32, #tpu.memory_space<vmem>>, vector<8x32xf32>
    %cst_37 = arith.constant dense<0.000000e+00> : vector<8x32xf32>
    %57 = tpu.matmul %55, %56, %cst_37 {dimension_numbers = #tpu.dot_dimension_numbers<[1], [0], [0], [1], [0, 0, 1, 1], [], []>} : vector<8x8xf32>, vector<8x32xf32>, vector<8x32xf32> -> vector<8x32xf32>
    %58 = arith.addf %53, %57 : vector<8x32xf32>
    %59 = vector.extract_strided_slice %44 {offsets = [3, 0, 0], sizes = [1, 8, 8], strides = [1, 1, 1]} : vector<4x8x8xf32> to vector<1x8x8xf32>
    %60 = vector.shape_cast %59 : vector<1x8x8xf32> to vector<8x8xf32>
    %c24 = arith.constant 24 : index
    %c0_38 = arith.constant 0 : index
    %61 = vector.load %arg6[%c24, %c0_38] : memref<32x32xf32, #tpu.memory_space<vmem>>, vector<8x32xf32>
    %cst_39 = arith.constant dense<0.000000e+00> : vector<8x32xf32>
    %62 = tpu.matmul %60, %61, %cst_39 {dimension_numbers = #tpu.dot_dimension_numbers<[1], [0], [0], [1], [0, 0, 1, 1], [], []>} : vector<8x8xf32>, vector<8x32xf32>, vector<8x32xf32> -> vector<8x32xf32>
    %63 = arith.addf %58, %62 : vector<8x32xf32>
    %c0_40 = arith.constant 0 : index
    %c0_41 = arith.constant 0 : index
    %64 = vector.load %arg8[%c0_40, %c0_41] : memref<1x32xf32, #tpu.memory_space<vmem>>, vector<1x32xf32>
    %65 = vector.broadcast %64 : vector<1x32xf32> to vector<8x32xf32>
    %66 = arith.addf %63, %65 : vector<8x32xf32>
    %c0_42 = arith.constant 0 : index
    %c0_43 = arith.constant 0 : index
    %c0_44 = arith.constant 0 : index
    %67 = vector.load %arg9[%c0_42, %c0_43, %c0_44] : memref<1x8x32xf32, #tpu.memory_space<vmem>>, vector<1x8x32xf32>
    %68 = vector.shape_cast %67 : vector<1x8x32xf32> to vector<8x32xf32>
    %69 = vector.shape_cast %66 : vector<8x32xf32> to vector<1x8x32xf32>
    tpu.vector_store %arg9[%c0_42, %c0_43, %c0_44], %69 {strides = array<i32>} : memref<1x8x32xf32, #tpu.memory_space<vmem>>, vector<1x8x32xf32>,
    return
  }
  func.func @transform_0(%arg0: i32, %arg1: i32) -> (i32, i32, i32) {
    %c0_i32 = arith.constant 0 : i32
    %c0_i32_0 = arith.constant 0 : i32
    %c0_i32_1 = arith.constant 0 : i32
    return %arg0, %c0_i32, %c0_i32_0 : i32, i32, i32
  }
  func.func @transform_1(%arg0: i32, %arg1: i32) -> (i32, i32, i32) {
    %c0_i32 = arith.constant 0 : i32
    %c0_i32_0 = arith.constant 0 : i32
    %c0_i32_1 = arith.constant 0 : i32
    return %arg0, %c0_i32, %c0_i32_0 : i32, i32, i32
  }
  func.func @transform_2(%arg0: i32, %arg1: i32) -> (i32, i32, i32) {
    %c0_i32 = arith.constant 0 : i32
    %c0_i32_0 = arith.constant 0 : i32
    %c0_i32_1 = arith.constant 0 : i32
    return %arg0, %c0_i32, %c0_i32_0 : i32, i32, i32
  }
  func.func @transform_3(%arg0: i32, %arg1: i32) -> (i32, i32, i32) {
    %c0_i32 = arith.constant 0 : i32
    %c0_i32_0 = arith.constant 0 : i32
    %c0_i32_1 = arith.constant 0 : i32
    return %c0_i32, %c0_i32_0, %arg1 : i32, i32, i32
  }
  func.func @transform_4(%arg0: i32, %arg1: i32) -> (i32, i32) {
    %c0_i32 = arith.constant 0 : i32
    %c0_i32_0 = arith.constant 0 : i32
    return %arg1, %c0_i32 : i32, i32
  }
  func.func @transform_5(%arg0: i32, %arg1: i32) -> (i32, i32) {
    %c0_i32 = arith.constant 0 : i32
    %c0_i32_0 = arith.constant 0 : i32
    return %c0_i32, %arg1 : i32, i32
  }
  func.func @transform_6(%arg0: i32, %arg1: i32) -> (i32, i32) {
    %c0_i32 = arith.constant 0 : i32
    %c0_i32_0 = arith.constant 0 : i32
    %c0_i32_1 = arith.constant 0 : i32
    return %c0_i32, %c0_i32_0 : i32, i32
  }
  func.func @transform_7(%arg0: i32, %arg1: i32) -> (i32, i32, i32) {
    %c0_i32 = arith.constant 0 : i32
    %c0_i32_0 = arith.constant 0 : i32
    %c0_i32_1 = arith.constant 0 : i32
    return %arg0, %c0_i32, %c0_i32_0 : i32, i32, i32
  }
  func.func @transform_8(%arg0: i32, %arg1: i32) -> (i32, i32, i32, i32) {
    %c0_i32 = arith.constant 0 : i32
    %c0_i32_0 = arith.constant 0 : i32
    %c0_i32_1 = arith.constant 0 : i32
    return %arg0, %arg1, %c0_i32, %c0_i32_0 : i32, i32, i32, i32
  }
}

</mosaic_0001>

<bundles_post_ra>
// kernel: tpu_custom_call.1
= control target key start
LH: loop header
LB: loop body
LE: loop exit
PB: predicated region body
PF: predicated region fallthrough
CT: control target
= control target key end

     0   :  { %s3533_s0 = inlined_call_operand.hbm [shape: f32[2,8,32], index: 0, kind: input, shape index: {}]   ;;  %s3534_s1 = inlined_call_operand.hbm [shape: f32[2,8,32], index: 1, kind: input, shape index: {}]   ;;  %s3535_s2 = inlined_call_operand.hbm [shape: f32[2,8,32], index: 2, kind: input, shape index: {}]   ;;  %s3536_s3 = inlined_call_operand.hbm [shape: f32[3,32,32], index: 3, kind: input, shape index: {}]   ;;  %s3537_s4 = inlined_call_operand.hbm [shape: f32[32,32], index: 4, kind: input, shape index: {}]   ;;  %s3538_s5 = inlined_call_operand.vmem [shape: f32[3,32], index: 5, kind: input, shape index: {}]   ;;  %s3539_s6 = inlined_call_operand.vmem [shape: f32[1,32], index: 6, kind: input, shape index: {}]   ;;  %s3540_s7 = inlined_call_operand.hbm [shape: f32[2,8,32], index: 7, kind: output, shape index: {0}]   ;;  %s3541_s8 = inlined_call_operand.hbm [shape: f32[2,4,8,8], index: 8, kind: output, shape index: {1}]  }
   0x1   :  { %3562 = sst [smem:[#allocation25_spill]] %s3534_s1 }
   0x2   :  { %3563 = sst [smem:[#allocation26_spill]] %s3536_s3 }
   0x3   :  { %3564 = sst [smem:[#allocation27_spill]] %s3537_s4 }
   0x4   :  { %14 = vsyncpa [#allocation3], 0 }
   0x5   :  { %16 = vsyncpa [#allocation3 + $0x1], 0 }
   0x6   :  { %17 = vsyncpa [#allocation6], 0 }
   0x7   :  { %19 = vsyncpa [#allocation6 + $0x1], 0 }
   0x8   :  { %20 = vsyncpa [#allocation9], 0 }
   0x9   :  { %21 = vsyncpa [#allocation4], 0 }
   0xa   :  { %23 = vsyncpa [#allocation4 + $0x1], 0 }
   0xb   :  { %24 = vsyncpa [#allocation13], 0 }
   0xc   :  { %26 = vsyncpa [#allocation13 + $0x1], 0  ;;  %s3021_s27 = smov 0   ;;  %s3023_s28 = smov 0  }
   0xd   :  { %s3025_s29 = smov 0   ;;  %s3027_s30 = smov 0  }
   0xe   :  { %s3029_s9 = smov 0   ;;  %s3031_s10 = smov 0  }
   0xf LB: > { %3565 = sst [smem:[#allocation19_spill]] %s2935_s27  ;;  %s3052_s11 = sadd.s32 4294967295, %s2955_s10   ;;  %s2955_s10 = sphi %s3031_s10, %s32_s10   ;;  %s2951_s9 = sphi %s3029_s9, %s3603_s9   ;;  %s2947_s30 = sphi %s3027_s30, %s3602_s30   ;;  %s2943_s29 = sphi %s3025_s29, %s3606_s29   ;;  %s2939_s28 = sphi %s3023_s28, %s3605_s28   ;;  %s2935_s27 = sphi %s3021_s27, %s3604_s27  }
  0x10   : > { %3566 = sst [smem:[#allocation20_spill]] %s2951_s9  ;;  %s2354_s12 = sadd.s32 4294967294, %s2955_s10  }
  0x11   : > { %3567 = sst [smem:[#allocation21_spill]] %s2955_s10  ;;  %p64_p0 = scmp.ne.s32.totalorder %s2939_s28, %s2935_s27 }
  0x12   : > { %p3542_p1 = scmp.eq.s32.totalorder %s3052_s11, 0  ;;  %p245_p3 = scmp.eq.s32.totalorder %s2354_s12, 1 }
  0x13   : > { %p2355_p5 = scmp.ge.s32.totalorder %s2955_s10, 1  ;;  %p280_p7 = scmp.lt.s32.totalorder %s2955_s10, 3 }
  0x14   : > { %p3061_p4 = por %p3542_p1, %p64_p0  ;;  %p3066_p6 = por %p245_p3, %p64_p0 }
  0x15   : > { %p3071_p8 = pnand %p2355_p5, %p280_p7  ;;  %s2957_s16 = smov [#allocation8]  }
  0x16   : > { %s3568_s13 = scalar_select %p3061_p4, 1, 0 }
  0x17   : > { %s3569_s14 = scalar_select %p3066_p6, 1, 0 }
  0x18   : > { %s3571_s15 = scalar_select %p3071_p8, 1, 0 }
  0x19   : > { %3570 = sst [smem:[#allocation22_spill]] %s3569_s14  ;;  %s294_s17 = sshll.u32 %s2957_s16, 4  ;;  %s295_s17 = int_to_ptr.vmem [resolvable:$true] %s294_s17 }
  0x1a   : > { %p2579_p9 = pneg %p3071_p8  ;;  %s44_s19 = sadd.s32 1, %s2951_s9 }
  0x1b   : > { %s3573_s3 = sld [smem:[#allocation26_spill]] }
  0x1c   : > { %p3080_p11 = pnand %p2579_p9, %p3542_p1 }
  0x1e   : > { %s3572_s18 = scalar_select %p3080_p11, 1, 0 }
  0x1f   : > { %p3554_p13 = pneg %p3080_p11 }
  0x21   : > { %s2687_s22 = scalar_lea.hbm %s3573_s3, 1536 }
  0x22   : > { %p2688_p12 = scmp.ne.s32.totalorder %s3573_s3, %s2687_s22  ;;  %p2694_p5 = scmp.lt.u32.totalorder %s2687_s22, %s3573_s3 }
  0x24   : > { %p2690_p0 = pnand %p3554_p13, %p2688_p12 }
  0x26   : > { %p2691_p3 = pneg %p2690_p0 }
  0x28   : > { %p2696_p7 = pnand %p2694_p5, %p2691_p3 }
  0x2a   : > { %2699 = shalt.err (!%p2696_p7)
}
  0x2b   : > { %s2700_s12 = scalar_lea.vmem %s295_s17, 1536  ;;  %p2708_p2 = scmp.lt.s32.totalorder %s295_s17, %s295_s17 }
  0x2c   : > { %p2701_p9 = scmp.ne.s32.totalorder %s295_s17, %s2700_s12  ;;  %p2709_p6 = scmp.lt.s32.totalorder %s2700_s12, %s2700_s12 }
  0x2e   : > { %p2703_p10 = pnand %p2701_p9, %p3554_p13  ;;  %p2710_p4 = por %p2709_p6, %p2708_p2 }
  0x30   : > { %p2704_p1 = pneg %p2703_p10 }
  0x32   : > { %p2711_p8 = pnand %p2710_p4, %p2704_p1 }
  0x34   : > { %2714 = shalt.err (!%p2711_p8)
}
  0x35   : > { %s3545_s16 = smov 128   ;;  %s3546_s20 = smov 8  }
  0x36   : > { %2582 = dma.hbm_to_vmem [thread:$0]  (!%p3080_p11), %s3573_s3, 1536, %s295_s17, [#allocation9], %s3545_s16, %s3545_s16, %s3546_s20  }
  0x37   : > { %p46_p1 = scmp.ge.s32.totalorder %s44_s19, 2  ;;  %s51_s23 = sadd.s32 1, %s2943_s29 }
  0x38   : > { %p58_p2 = scmp.ne.s32.totalorder %s2943_s29, %s2939_s28  ;;  %p59_p4 = scmp.eq.s32.totalorder %s2955_s10, 0 }
  0x39   : > { %s3608_s19 = smov (%p46_p1, %s44_s19), 0  ;;  %p3575_p8 = scmp.eq.s32.totalorder %s3052_s11, 1 }
  0x3a   : > { %3574 = sst [smem:[#allocation23_spill]] %s3608_s19  ;;  %p60_p6 = por %p59_p4, %p58_p2 }
  0x3b   : > { %p3118_p10 = por %p3575_p8, %p58_p2  ;;  %s48_s25 = ssub.s32 %s2951_s9, %s3608_s19 }
  0x3c   : > { %p2605_p12 = scmp.lt.s32.totalorder %s2955_s10, 2  ;;  %p49_p0 = scmp.eq.s32.totalorder %s48_s25, 0 }
  0x3d   : > { %s3576_s24 = scalar_select %p3118_p10, 1, 0 }
  0x3e   : > { %s3547_s26 = sand.u32 1, %s2943_s29   ;;  %s3131_s12 = sshll.u32 %s2951_s9, 7 }
  0x3f   : > { %s3128_s17 = sshll.u32 %s3547_s26, 3  ;;  %p3136_p3 = pnand %p2605_p12, %p60_p6 }
  0x40   : > { %s3134_s21 = scalar_select %p49_p0, %s2943_s29, %s51_s23  }
  0x41   : > { %s3578_s22 = scalar_select %p3136_p3, 1, 0 }
  0x42   : > { %3577 = sst [smem:[#allocation24_spill]] %s3134_s21  ;;  %s352_s16 = sand.u32 1, %s2955_s10  }
  0x43   : > { %s3579_s1 = sld [smem:[#allocation25_spill]]  ;;  %s356_s26 = scalar_lea.vmem [#allocation5], %s3128_s17 }
  0x44   : > { %s363_s19 = sshll.u32 %s356_s26, 4  ;;  %s2960_s23 = smov [#allocation10]   ;;  %s3148_s19 = int_to_ptr.vmem [resolvable:$true] %s363_s19 }
  0x45   : > { %s3150_s9 = sshll.u32 %s2960_s23, 4  ;;  %s3152_s21 = scalar_lea.sflag [#allocation6], %s352_s16  ;;  %s311_s9 = int_to_ptr.vmem [resolvable:$true] %s3150_s9 }
  0x46   : > { %p3158_p7 = pneg %p3136_p3 }
  0x48   : > { %s3580_s3 = scalar_select %p3158_p7, 1, 0 }
  0x49   : > { %s3145_s25 = scalar_lea.hbm %s3579_s1, %s3131_s12  ;;  %s2720_s10 = scalar_lea.hbm %s3579_s1, 256 }
  0x4a   : > { %s2715_s14 = scalar_lea.hbm %s3145_s25, 128  ;;  %p2721_p2 = scmp.lt.u32.totalorder %s3145_s25, %s3579_s1 }
  0x4b   : > { %p2716_p5 = scmp.ne.s32.totalorder %s3145_s25, %s2715_s14  ;;  %p2722_p4 = scmp.lt.u32.totalorder %s2720_s10, %s2715_s14 }
  0x4c   : > { %p2724_p8 = scmp.lt.u32.totalorder %s2715_s14, %s3145_s25 }
  0x4d   : > { %p2718_p9 = pnand %p3158_p7, %p2716_p5  ;;  %p2723_p6 = por %p2722_p4, %p2721_p2 }
  0x4f   : > { %p2719_p1 = pneg %p2718_p9  ;;  %p2725_p12 = por %p2724_p8, %p2723_p6 }
  0x51   : > { %p2726_p0 = pnand %p2725_p12, %p2719_p1 }
  0x53   : > { %2729 = shalt.err (!%p2726_p0)
}
  0x54   : > { %s2730_s16 = scalar_lea.vmem %s3148_s19, 128  ;;  %s2961_s20 = smov [#allocation5]  }
  0x55   : > { %p2731_p5 = scmp.ne.s32.totalorder %s3148_s19, %s2730_s16  ;;  %s2735_s26 = sshll.u32 %s2961_s20, 4  ;;  %s2736_s26 = int_to_ptr.vmem [resolvable:$false] %s2735_s26 }
  0x56   : > { %s2737_s27 = scalar_lea.vmem %s2736_s26, 256  ;;  %p2738_p10 = scmp.lt.s32.totalorder %s3148_s19, %s2736_s26 }
  0x57   : > { %p2733_p9 = pnand %p2731_p5, %p3158_p7  ;;  %p2739_p11 = scmp.lt.s32.totalorder %s2737_s27, %s2730_s16 }
  0x59   : > { %p2734_p13 = pneg %p2733_p9  ;;  %p2740_p2 = por %p2739_p11, %p2738_p10 }
  0x5b   : > { %p2741_p4 = pnand %p2740_p2, %p2734_p13 }
  0x5d   : > { %2744 = shalt.err (!%p2741_p4)
}
  0x5e   : > { %2592 = dma.hbm_to_vmem [thread:$0]  (!%p3136_p3), %s3145_s25, 128, %s3148_s19, %s3152_s21  }
  0x5f   : > { %s3581_s4 = sld [smem:[#allocation27_spill]]  ;;  %p3582_p11 = scmp.ne.s32.totalorder %s3572_s18, 0 }
  0x61   : > { %p3583_p13 = pneg %p3582_p11 }
  0x65   : > { %s2745_s23 = scalar_lea.hbm %s3581_s4, 512 }
  0x66   : > { %p2746_p1 = scmp.ne.s32.totalorder %s3581_s4, %s2745_s23  ;;  %p2752_p8 = scmp.lt.u32.totalorder %s2745_s23, %s3581_s4 }
  0x68   : > { %p2748_p10 = pnand %p2746_p1, %p3583_p13 }
  0x6a   : > { %p2749_p6 = pneg %p2748_p10 }
  0x6c   : > { %p2754_p12 = pnand %p2752_p8, %p2749_p6 }
  0x6e   : > { %2757 = shalt.err (!%p2754_p12)
}
  0x6f   : > { %s2758_s19 = scalar_lea.vmem %s311_s9, 512  ;;  %p3584_p5 = pmov %p3583_p13 }
  0x70   : > { %p2759_p0 = scmp.ne.s32.totalorder %s311_s9, %s2758_s19  ;;  %p2766_p4 = scmp.lt.s32.totalorder %s311_s9, %s311_s9 }
  0x71   : > { %p2767_p3 = scmp.lt.s32.totalorder %s2758_s19, %s2758_s19 }
  0x72   : > { %p2761_p9 = pnand %p2759_p0, %p3584_p5 }
  0x73   : > { %p2768_p7 = por %p2767_p3, %p2766_p4 }
  0x74   : > { %p2762_p2 = pneg %p2761_p9 }
  0x76   : > { %p2769_p1 = pnand %p2768_p7, %p2762_p2 }
  0x78   : > { %2772 = shalt.err (!%p2769_p1)
}
  0x79   : > { %s3585_s1 = smov 8   ;;  %s3586_s25 = smov 128  }
  0x7a   : > { %2585 = dma.hbm_to_vmem [thread:$0]  (!%p3582_p11), %s3581_s4, 512, %s311_s9, [#allocation9], %s3586_s25, %s3586_s25, %s3585_s1  }
  0x7b   : > { %s3210_s20 = scalar_lea.hbm %s3533_s0, %s3131_s12  ;;  %s338_s18 = scalar_lea.vmem [#allocation2], %s3128_s17 }
  0x7c   : > { %s345_s16 = sshll.u32 %s338_s18, 4  ;;  %s3219_s27 = scalar_lea.hbm %s3535_s2, %s3131_s12  ;;  %s3213_s16 = int_to_ptr.vmem [resolvable:$true] %s345_s16 }
  0x7d   : > { %s3587_s10 = sand.u32 1, %s2943_s29   ;;  %s2773_s1 = scalar_lea.hbm %s3210_s20, 128 }
  0x7e   : > { %s335_s9 = scalar_lea.sflag [#allocation3], %s3587_s10  ;;  %p2774_p3 = scmp.ne.s32.totalorder %s3210_s20, %s2773_s1 }
  0x7f   : > { %p3588_p7 = scmp.ne.s32.totalorder %s3580_s3, 0  ;;  %s2778_s23 = scalar_lea.hbm %s3533_s0, 256 }
  0x80   : > { %p2779_p10 = scmp.lt.u32.totalorder %s3210_s20, %s3533_s0  ;;  %p2780_p6 = scmp.lt.u32.totalorder %s2778_s23, %s2773_s1 }
  0x81   : > { %p2776_p11 = pnand %p2774_p3, %p3588_p7  ;;  %p2782_p12 = scmp.lt.u32.totalorder %s2773_s1, %s3210_s20 }
  0x82   : > { %p2781_p8 = por %p2780_p6, %p2779_p10 }
  0x83   : > { %p2777_p13 = pneg %p2776_p11 }
  0x84   : > { %p2783_p0 = por %p2782_p12, %p2781_p8 }
  0x86   : > { %p2784_p5 = pnand %p2783_p0, %p2777_p13 }
  0x88   : > { %2787 = shalt.err (!%p2784_p5)
}
  0x89   : > { %s2788_s12 = scalar_lea.vmem %s3213_s16, 128  ;;  %s2962_s26 = smov [#allocation2]  }
  0x8a   : > { %p2789_p9 = scmp.ne.s32.totalorder %s3213_s16, %s2788_s12  ;;  %s2793_s19 = sshll.u32 %s2962_s26, 4  ;;  %s2794_s19 = int_to_ptr.vmem [resolvable:$false] %s2793_s19 }
  0x8b   : > { %s2795_s4 = scalar_lea.vmem %s2794_s19, 256  ;;  %p2796_p1 = scmp.lt.s32.totalorder %s3213_s16, %s2794_s19 }
  0x8c   : > { %p2791_p2 = pnand %p2789_p9, %p3588_p7  ;;  %p2797_p3 = scmp.lt.s32.totalorder %s2795_s4, %s2788_s12 }
  0x8e   : > { %p2792_p4 = pneg %p2791_p2  ;;  %p2798_p11 = por %p2797_p3, %p2796_p1 }
  0x90   : > { %p2799_p10 = pnand %p2798_p11, %p2792_p4 }
  0x92   : > { %2802 = shalt.err (!%p2799_p10)
}
  0x93   : > { %p3589_p13 = scmp.ne.s32.totalorder %s3578_s22, 0  ;;  %s374_s10 = scalar_lea.vmem [#allocation7], %s3128_s17 }
  0x94   : > { %s381_s1 = sshll.u32 %s374_s10, 4  ;;  %s2803_s25 = scalar_lea.hbm %s3219_s27, 128  ;;  %s382_s1 = int_to_ptr.vmem [resolvable:$true] %s381_s1 }
  0x95   : > { %2589 = dma.hbm_to_vmem [thread:$0]  (!%p3589_p13), %s3210_s20, 128, %s3213_s16, %s335_s9  }
  0x96   : > { %p2804_p6 = scmp.ne.s32.totalorder %s3219_s27, %s2803_s25  ;;  %s2808_s18 = scalar_lea.hbm %s3535_s2, 256 }
  0x97   : > { %p2809_p0 = scmp.lt.u32.totalorder %s3219_s27, %s3535_s2  ;;  %p2810_p5 = scmp.lt.u32.totalorder %s2808_s18, %s2803_s25 }
  0x98   : > { %p2806_p8 = pnand %p2804_p6, %p3588_p7  ;;  %p2812_p2 = scmp.lt.u32.totalorder %s2803_s25, %s3219_s27 }
  0x99   : > { %p2811_p9 = por %p2810_p5, %p2809_p0 }
  0x9a   : > { %p2807_p12 = pneg %p2806_p8 }
  0x9b   : > { %p2813_p4 = por %p2812_p2, %p2811_p9 }
  0x9d   : > { %p2814_p1 = pnand %p2813_p4, %p2807_p12 }
  0x9f   : > { %2817 = shalt.err (!%p2814_p1)
}
  0xa0   : > { %s2818_s17 = scalar_lea.vmem %s382_s1, 128  ;;  %s2963_s20 = smov [#allocation7]  }
  0xa1   : > { %p2819_p3 = scmp.ne.s32.totalorder %s382_s1, %s2818_s17  ;;  %s2823_s16 = sshll.u32 %s2963_s20, 4  ;;  %s2824_s16 = int_to_ptr.vmem [resolvable:$false] %s2823_s16 }
  0xa2   : > { %s2825_s9 = scalar_lea.vmem %s2824_s16, 256  ;;  %p2826_p6 = scmp.lt.s32.totalorder %s382_s1, %s2824_s16 }
  0xa3   : > { %p2821_p11 = pnand %p2819_p3, %p3588_p7  ;;  %p2827_p8 = scmp.lt.s32.totalorder %s2825_s9, %s2818_s17 }
  0xa5   : > { %p2822_p10 = pneg %p2821_p11  ;;  %p2828_p13 = por %p2827_p8, %p2826_p6 }
  0xa7   : > { %p2829_p0 = pnand %p2828_p13, %p2822_p10 }
  0xa9   : > { %2832 = shalt.err (!%p2829_p0)
}
  0xaa   : > { %p3590_p5 = scmp.ne.s32.totalorder %s3578_s22, 0  ;;  %p3591_p12 = scmp.ne.s32.totalorder %s3571_s15, 0 }
  0xab   : > { %s3266_s3 = sand.u32 (!%p3591_p12), 1, %s2939_s28   ;;  %p3592_p7 = scmp.ne.s32.totalorder (!%p3591_p12), %s3568_s13, 0 }
  0xac   : > { %2595 = dma.hbm_to_vmem [thread:$0]  (!%p3590_p5), %s3219_s27, 128, %s382_s1, %s3152_s21  }
  0xad   : > { %390 = sbr.rel (%p3591_p12) target bundleno = 1546 (0x60a), region = 48  ;;  %s3269_s19 = sshll.u32 (!%p3591_p12), %s3266_s3, 3 }
  0xae   : > { %s393_s4 = scalar_lea.sflag (!%p3591_p12), [#allocation3], %s3266_s3  ;;  %s396_s10 = scalar_lea.vmem (!%p3591_p12), [#allocation2], %s3269_s19 }
  0xb4   : > { %2914 = dma.done.wait (%p3592_p7), %s393_s4, 128  }
  0xb5   : > { %2916 = vsyncadd (%p3592_p7), %s393_s4, 4294967168  ;;  %s401_s15 = sand.u32 1, %s3052_s11   ;;  %s405_s22 = scalar_lea.vmem [#allocation5], %s3269_s19 }
  0xb6   : > { %s402_s21 = scalar_lea.sflag [#allocation6], %s401_s15 }
  0xb7   : > { %2918 = dma.done.wait (%p3592_p7), %s402_s21, 256  }
  0xb8   : > { %2920 = vsyncadd (%p3592_p7), %s402_s21, 4294967040  ;;  %s414_s27 = scalar_lea.vmem [#allocation7], %s3269_s19  ;;  %p3593_p13 = scmp.eq.s32.totalorder %s3052_s11, 0 }
  0xba   : > { %2922 = dma.done.wait (%p3593_p13), [#allocation9], 2048   ;;  %p3594_p9 = pmov %p3593_p13 }
  0xbb   : > { %v2964_v0 = vmov 0.0|0.0   ;;  %vm2965_vm0 = vmmov 0   ;;  %v2966_v1 = vmov 0.0   ;;  %v567_v2 = vld [vmem:[#allocation8 + $0x20] sm:$0xff]  ;;  %v568_v3 = vld [vmem:[#allocation8 + $0x28] sm:$0xff]  ;;  %v569_v7 = vld [vmem:[#allocation8 + $0x30] sm:$0xff]  ;;  %v747_v33 = vlaneseq }
  0xbc   : > { %2924 = vsyncadd (%p3594_p9), [#allocation9], 4294965248  ;;  %2549 = vmatprep.subr.bf16.mxu1 %v2964_v0  ;;  %2543 = vmatprep.subr.bf16.mxu0 %v2964_v0  ;;  %v483_v4 = vld [vmem:[#allocation8] sm:$0xff]  ;;  %v2550_v5 = vpack.c.bf16 %v568_v3, %v567_v2  ;;  %v484_v6 = vld [vmem:[#allocation8 + $0x8] sm:$0xff]  ;;  %vm492_vm1 = vcmask 261120   ;;  %s2967_s14 = smov 104  }
  0xbd   : > { %2469 = vmatprep.mubr.msk.f32.mxu1 %vm2965_vm0, %v2966_v1  ;;  %2458 = vmatprep.mubr.msk.f32.mxu0 %vm2965_vm0, %v2966_v1  ;;  %v570_v8 = vld [vmem:[#allocation8 + $0x38] sm:$0xff]  ;;  %v2544_v9 = vpack.c.bf16 %v484_v6, %v483_v4  ;;  %v485_v10 = vld [vmem:[#allocation8 + $0x10] sm:$0xff]  ;;  %v481_v14 = vld [vmem:[%s405_s22] sm:$0xff]  ;;  %s2968_s23 = smov 120   ;;  %s2969_s18 = smov 112   ;;  %v748_v37 = vshrl.u32 %v747_v33, 7 }
  0xbe   : > { %v486_v11 = vld [vmem:[#allocation8 + $0x18] sm:$0xff]  ;;  %2551 = vmatpush3.bf16.msra.mxu1 %v2550_v5  ;;  %v2553_v12 = vpack.c.bf16 %v570_v8, %v569_v7  ;;  %v650_v16 = vld [vmem:[#allocation8 + $0x40] sm:$0xff]  ;;  %v651_v17 = vld [vmem:[#allocation8 + $0x48] sm:$0xff]  ;;  %v2970_v31 = vmov 1983009808   ;;  %vm1170_vm2 = vcmask 64512  }
  0xbf   : > { %2545 = vmatpush3.bf16.msra.mxu0 %v2544_v9  ;;  %2552 = vmatprep.subr.bf16.mxu1 %v2964_v0  ;;  %v2547_v13 = vpack.c.bf16 %v486_v11, %v485_v10  ;;  %v480_v15 = vld [vmem:[%s396_s10] sm:$0xff]  ;;  %v2556_v19 = vpack.c.bf16 %v651_v17, %v650_v16  ;;  %v745_v32 = vunpack.c.l.s4 %v2970_v31  ;;  %v2971_v34 = vmov 1934713408   ;;  %s2373_s17 = sshll.u32 %s3266_s3, 5  ;;  %s2410_s16 = sshll.u32 %s2947_s30, 9 }
  0xc0   : > { %2546 = vmatprep.subr.bf16.mxu0 %v2964_v0  ;;  %v2376_v18 = vld [vmem:[%s3538_s5 + $0x1] ss:$0 sm:$0xff]  ;;  %v2374_v21 = vld [vmem:[%s3538_s5] ss:$0 sm:$0xff]  ;;  %v653_v26 = vld [vmem:[#allocation8 + $0x58] sm:$0xff]  ;;  %v777_v35 = vunpack.c.l.s4 %v2971_v34  ;;  %s3390_s20 = scalar_lea.vmem [#allocation12], %s2373_s17  ;;  %s3447_s15 = scalar_lea.hbm %s3541_s8, %s2410_s16 }
  0xc1   : > { %v652_v25 = vld [vmem:[#allocation8 + $0x50] sm:$0xff]  ;;  %v746_v36 = vunpack.c.0.s8 %v745_v32  ;;  %s2156_s9 = sshll.u32 %s3390_s20, 4  ;;  %s2128_s21 = scalar_lea.sflag [#allocation13], %s3266_s3  ;;  %s3449_s9 = int_to_ptr.vmem [resolvable:$true] %s2156_s9 }
  0xc2   : > { %2554 = vmatpush3.bf16.msra.mxu1 %v2553_v12  ;;  %v2559_v28 = vpack.c.bf16 %v653_v26, %v652_v25  ;;  %v482_v30 = vld [vmem:[%s414_s27] sm:$0xff]  ;;  %v778_v40 = vunpack.c.0.s8 %v777_v35  ;;  %s2833_s22 = scalar_lea.vmem %s3449_s9, 512  ;;  %p3595_p4 = scmp.ne.s32.totalorder %s3576_s24, 0 }
  0xc3   : > { %2548 = vmatpush3.bf16.msra.mxu0 %v2547_v13  ;;  %2483 = vmatprep.subr.mxu1 %v2966_v1  ;;  %v3319_v41 = vsub.s32 %v746_v36, %v748_v37  ;;  %p2834_p2 = scmp.ne.s32.totalorder %s3449_s9, %s2833_s22  ;;  %s2972_s27 = smov [#allocation12]  }
  0xc4   : > { %2555 = vmatprep.subr.bf16.mxu0 %v2964_v0  ;;  %v3321_v48 = vsub.s32 %v778_v40, %v748_v37  ;;  %s2837_s11 = sshll.u32 %s2972_s27, 4  ;;  %s2838_s11 = int_to_ptr.vmem [resolvable:$false] %s2837_s11 }
  0xc5   : > { %2470 = vmatmul.mubr.msk.f32.vlgmr.msra.gmra.mrb[0].mxu1 %vm492_vm1, %v481_v14  ;;  %p2835_p1 = pnand %p2834_p2, %p3595_p4  ;;  %s2839_s13 = scalar_lea.vmem %s2838_s11, 1024 }
  0xc6   : > { %2459 = vmatmul.mubr.msk.f32.vlgmr.msra.gmra.mrb[0].mxu0 %vm492_vm1, %v480_v15  ;;  %2485 = vmatprep.mubr.msk.f32.mxu1 %vm2965_vm0, %v2966_v1  ;;  %p2840_p11 = scmp.lt.s32.totalorder %s3449_s9, %s2838_s11  ;;  %p2841_p10 = scmp.lt.s32.totalorder %s2839_s13, %s2833_s22 }
  0xc7   : > { %2480 = vmatprep.mubr.msk.f32.mxu0 %vm2965_vm0, %v2966_v1  ;;  %2557 = vmatpush3.bf16.msra.mxu0 %v2556_v19  ;;  %p2836_p3 = pneg %p2835_p1 }
  0xc8   : > { %2558 = vmatprep.subr.bf16.mxu0 %v2964_v0  ;;  %p2842_p6 = por %p2841_p10, %p2840_p11 }
  0xca   : > { %p2843_p8 = pnand %p2842_p6, %p2836_p3 }
  0xcb   : > { %2560 = vmatpush3.bf16.msra.mxu0 %v2559_v28 }
  0xcc   : > { %2493 = vmatprep.subr.mxu0 %v2966_v1 }
  0xce   : > { %2481 = vmatmul.mubr.msk.f32.vlgmr.msra.gmra.mrb[2].mxu0 %vm492_vm1, %v482_v30 }
  0xcf   : > { %2495 = vmatprep.mubr.msk.f32.mxu0 %vm2965_vm0, %v2966_v1 }
 0x198   : > { %v645_v20 = vpop.f32.mrb[0].mxu1 }
 0x199   : > { %v646_v22 = vadd.f32 %v2376_v18, %v645_v20  ;;  %v2471_v23 = vpop.f32.mrb[1].mxu1  ;;  %v562_v24 = vpop.f32.mrb[0].mxu0 }
 0x19a   : > { %v2460_v27 = vpop.f32.mrb[1].mxu0  ;;  %v563_v29 = vadd.f32 %v2374_v21, %v562_v24 }
 0x19b   : > { %885 = vrot.lane.b32.xlu1 %v646_v22, %s2967_s14  ;;  %879 = vrot.lane.b32.xlu0 %v646_v22, %s2968_s23 }
 0x19f   : > { %882 = vrot.lane.b32.xlu0 %v646_v22, %s2969_s18  ;;  %733 = vrot.lane.b32.xlu1 %v563_v29, %s2968_s23 }
 0x1a3   : > { %736 = vrot.lane.b32.xlu0 %v563_v29, %s2969_s18  ;;  %739 = vrot.lane.b32.xlu1 %v563_v29, %s2967_s14 }
 0x20d   : > { %v886_v38 = vpop.permute.xlu1 %885  ;;  %v880_v39 = vpop.permute.xlu0 %879 }
 0x20e   : > { %v904_v42 = vcombine.low %v880_v39, %v886_v38  ;;  %v905_v43 = vcombine.high %v880_v39, %v886_v38 }
 0x210   : > { %v912_v49 = vrot.slane %v904_v42, %v3319_v41  ;;  %v919_v50 = vrot.slane %v905_v43, %v3319_v41 }
 0x211   : > { %v883_v44 = vpop.permute.xlu0 %882  ;;  %v734_v45 = vpop.permute.xlu1 %733 }
 0x212   : > { %v888_v46 = vcombine.low %v646_v22, %v883_v44  ;;  %v889_v47 = vcombine.high %v646_v22, %v883_v44 }
 0x214   : > { %v896_v51 = vrot.slane %v888_v46, %v3319_v41  ;;  %v903_v52 = vrot.slane %v889_v47, %v3319_v41 }
 0x215   : > { %v737_v53 = vpop.permute.xlu0 %736  ;;  %v740_v54 = vpop.permute.xlu1 %739 }
 0x216   : > { %v920_v55 = vcombine.low %v896_v51, %v912_v49  ;;  %v921_v56 = vcombine.high %v896_v51, %v912_v49  ;;  %v936_v57 = vcombine.low %v903_v52, %v919_v50  ;;  %v937_v58 = vcombine.high %v903_v52, %v919_v50 }
 0x217   : > { %v742_v59 = vcombine.low %v563_v29, %v737_v53  ;;  %v743_v60 = vcombine.high %v563_v29, %v737_v53  ;;  %v758_v61 = vcombine.low %v734_v45, %v740_v54  ;;  %v759_v62 = vcombine.high %v734_v45, %v740_v54 }
 0x218   : > { %v928_v63 = vrot.slane %v920_v55, %v3321_v48  ;;  %v935_v0 = vrot.slane %v921_v56, %v3321_v48  ;;  %v944_v2 = vrot.slane %v936_v57, %v3321_v48  ;;  %v951_v3 = vrot.slane %v937_v58, %v3321_v48  ;;  %v728_v58 = vpop.f32.mrb[2].mxu0 }
 0x219   : > { %v750_v4 = vrot.slane %v742_v59, %v3319_v41  ;;  %v757_v5 = vrot.slane %v743_v60, %v3319_v41  ;;  %v766_v6 = vrot.slane %v758_v61, %v3319_v41  ;;  %v773_v7 = vrot.slane %v759_v62, %v3319_v41  ;;  %v2482_v59 = vpop.f32.mrb[3].mxu0 }
 0x21a   : > { %v956_v8 = vcombine.low %v928_v63, %v935_v0  ;;  %v2382_v9 = vcombine.high %v928_v63, %v935_v0  ;;  %v972_v10 = vcombine.low %v944_v2, %v951_v3  ;;  %v2383_v11 = vcombine.high %v944_v2, %v951_v3 }
 0x21b   : > { %v774_v12 = vcombine.low %v750_v4, %v766_v6  ;;  %v775_v13 = vcombine.high %v750_v4, %v766_v6  ;;  %v790_v14 = vcombine.low %v757_v5, %v773_v7  ;;  %v791_v15 = vcombine.high %v757_v5, %v773_v7 }
 0x21c   : > { %v963_v16 = vrot.slane %v956_v8, %v3319_v41  ;;  %v971_v17 = vrot.slane %v2382_v9, %v3319_v41  ;;  %v979_v18 = vrot.slane %v972_v10, %v3319_v41  ;;  %v987_v19 = vrot.slane %v2383_v11, %v3319_v41  ;;  %v2378_v9 = vld [vmem:[%s3538_s5 + $0x2] ss:$0 sm:$0xff] }
 0x21d   : > { %v782_v20 = vrot.slane %v774_v12, %v3321_v48  ;;  %v789_v21 = vrot.slane %v775_v13, %v3321_v48  ;;  %v798_v22 = vrot.slane %v790_v14, %v3321_v48  ;;  %v805_v23 = vrot.slane %v791_v15, %v3321_v48 }
 0x21e   : > { %v988_v24 = vcombine.low %v963_v16, %v971_v17  ;;  %v989_v25 = vcombine.high %v963_v16, %v971_v17  ;;  %v1004_v26 = vcombine.low %v979_v18, %v987_v19  ;;  %v1005_v27 = vcombine.high %v979_v18, %v987_v19 }
 0x21f   : > { %v810_v28 = vcombine.low %v782_v20, %v789_v21  ;;  %v2380_v29 = vcombine.high %v782_v20, %v789_v21  ;;  %v826_v30 = vcombine.low %v798_v22, %v805_v23  ;;  %v2381_v31 = vcombine.high %v798_v22, %v805_v23 }
 0x220   : > { %v996_v32 = vrot.slane %v988_v24, %v3321_v48  ;;  %v1012_v33 = vrot.slane %v1004_v26, %v3321_v48  ;;  %v1003_v34 = vrot.slane %v989_v25, %v3321_v48  ;;  %v1019_v35 = vrot.slane %v1005_v27, %v3321_v48 }
 0x221   : > { %v817_v36 = vrot.slane %v810_v28, %v3319_v41  ;;  %v825_v37 = vrot.slane %v2380_v29, %v3319_v41  ;;  %v833_v38 = vrot.slane %v826_v30, %v3319_v41  ;;  %v841_v39 = vrot.slane %v2381_v31, %v3319_v41 }
 0x222   : > { %v1020_v40 = vcombine.low %v996_v32, %v1012_v33  ;;  %v1022_v42 = vcombine.low %v1003_v34, %v1019_v35  ;;  %v1021_v54 = vcombine.high %v996_v32, %v1012_v33  ;;  %v1023_v56 = vcombine.high %v1003_v34, %v1019_v35 }
 0x223   : > { %v842_v43 = vcombine.low %v817_v36, %v825_v37  ;;  %v843_v44 = vcombine.high %v817_v36, %v825_v37  ;;  %v858_v45 = vcombine.low %v833_v38, %v841_v39  ;;  %v859_v46 = vcombine.high %v833_v38, %v841_v39 }
 0x224   : > { %2484 = vmatpush3.xpose.msk.msra.mxu1 %vm1170_vm2, %v1020_v40  ;;  %2494 = vmatpush3.xpose.msk.msra.mxu0 %vm1170_vm2, %v1022_v42  ;;  %v729_v10 = vadd.f32 %v2378_v9, %v728_v58 }
 0x225   : > { %2488 = vmatprep.subr.mxu1 %v2966_v1  ;;  %v850_v47 = vrot.slane %v842_v43, %v3321_v48  ;;  %v866_v49 = vrot.slane %v858_v45, %v3321_v48  ;;  %v857_v50 = vrot.slane %v843_v44, %v3321_v48  ;;  %v873_v51 = vrot.slane %v859_v46, %v3321_v48 }
 0x226   : > { %2503 = vmatprep.subr.mxu0 %v2966_v1 }
 0x227   : > { %v874_v52 = vcombine.low %v850_v47, %v866_v49  ;;  %v876_v53 = vcombine.low %v857_v50, %v873_v51  ;;  %v875_v55 = vcombine.high %v850_v47, %v866_v49  ;;  %v877_v57 = vcombine.high %v857_v50, %v873_v51 }
 0x229   : > { %2486 = vmatmul.mubr.msk.f32.vlgmr.msra.gmra.mrb[2].mxu1 %vm1170_vm2, %v874_v52  ;;  %2496 = vmatmul.mubr.msk.f32.vlgmr.msra.gmra.mrb[4].mxu0 %vm1170_vm2, %v876_v53 }
 0x22a   : > { %2489 = vmatpush3.xpose.msk.msra.mxu1 %vm1170_vm2, %v1021_v54  ;;  %2490 = vmatprep.mubr.msk.f32.mxu1 %vm2965_vm0, %v2966_v1 }
 0x22b   : > { %2498 = vmatprep.subr.mxu1 %v2966_v1  ;;  %2505 = vmatprep.mubr.msk.f32.mxu0 %vm2965_vm0, %v2966_v1 }
 0x22d   : > { %2491 = vmatmul.mubr.msk.f32.vlgmr.msra.gmra.mrb[4].mxu1 %vm1170_vm2, %v875_v55 }
 0x22e   : > { %2499 = vmatpush3.xpose.msk.msra.mxu1 %vm1170_vm2, %v1023_v56  ;;  %2500 = vmatprep.mubr.msk.f32.mxu1 %vm2965_vm0, %v2966_v1 }
 0x22f   : > { %2508 = vmatprep.subr.mxu1 %v2966_v1 }
 0x231   : > { %2501 = vmatmul.mubr.msk.f32.vlgmr.msra.gmra.mrb[6].mxu1 %vm1170_vm2, %v877_v57 }
 0x232   : > { %2510 = vmatprep.mubr.msk.f32.mxu1 %vm2965_vm0, %v2966_v1 }
 0x2fc   : > { %v1243_v60 = vpop.f32.mrb[2].mxu1  ;;  %v1395_v61 = vpop.f32.mrb[4].mxu0 }
 0x2fd   : > { %v2487_v62 = vpop.f32.mrb[3].mxu1  ;;  %v2497_v63 = vpop.f32.mrb[5].mxu0  ;;  %v1475_v0 = vsel %vm1170_vm2, %v1243_v60, -inf  ;;  %v1481_v5 = vsel %vm1170_vm2, %v1395_v61, -inf }
 0x2fe   : > { %1476 = vmax.xlane.f32.xlu0 %v1475_v0 }
 0x300   : > { %v1319_v2 = vpop.f32.mrb[4].mxu1 }
 0x301   : > { %v2492_v3 = vpop.f32.mrb[5].mxu1  ;;  %v1478_v4 = vsel %vm1170_vm2, %v1319_v2, -inf }
 0x302   : > { %1479 = vmax.xlane.f32.xlu1 %v1478_v4  ;;  %1482 = vmax.xlane.f32.xlu0 %v1481_v5 }
 0x304   : > { %v1471_v6 = vpop.f32.mrb[6].mxu1 }
 0x305   : > { %v2502_v7 = vpop.f32.mrb[7].mxu1  ;;  %v1484_v8 = vsel %vm1170_vm2, %v1471_v6, -inf }
 0x306   : > { %1485 = vmax.xlane.f32.xlu0 %v1484_v8 }
 0x313   : > { %1025 = vrot.lane.b32.xlu1 %v729_v10, %s2968_s23 }
 0x38b   : > { %v1477_v11 = vpop.xlane.xlu0 %1476 }
 0x38c   : > { %v1487_v12 = vsub.f32 %v1243_v60, %v1477_v11 }
 0x38e   : > { %v1491_v13 = vmul.f32 1.442695, %v1487_v12 }
 0x38f   : > { %v1480_v14 = vpop.xlane.xlu1 %1479  ;;  %v1483_v15 = vpop.xlane.xlu0 %1482 }
 0x390   : > { %2671 = vpow2.f32 %v1491_v13  ;;  %v1488_v16 = vsub.f32 %v1319_v2, %v1480_v14  ;;  %v1489_v17 = vsub.f32 %v1395_v61, %v1483_v15 }
 0x392   : > { %v1493_v18 = vmul.f32 1.442695, %v1488_v16  ;;  %v1495_v19 = vmul.f32 1.442695, %v1489_v17 }
 0x393   : > { %v1486_v20 = vpop.xlane.xlu0 %1485  ;;  %v1026_v31 = vpop.permute.xlu1 %1025 }
 0x394   : > { %2673 = vpow2.f32 %v1493_v18  ;;  %v1490_v21 = vsub.f32 %v1471_v6, %v1486_v20  ;;  %v1815_v20 = vld [vmem:[#allocation10] sm:$0xff] }
 0x395   : > { %2675 = vpow2.f32 %v1495_v19 }
 0x396   : > { %v1497_v22 = vmul.f32 1.442695, %v1490_v21  ;;  %v1963_v21 = vld [vmem:[#allocation10 + $0x10] sm:$0xff] }
 0x398   : > { %2677 = vpow2.f32 %v1497_v22 }
 0x39a   : > { %v2672_v23 = vpop.eup %2671 }
 0x39b   : > { %v1499_v24 = vsel %vm1170_vm2, %v2672_v23, 0.0 }
 0x39c   : > { %1500 = vadd.xlane.f32.xlu1 %v1499_v24  ;;  %v2038_v24 = vld [vmem:[#allocation10 + $0x18] sm:$0xff] }
 0x39e   : > { %v2674_v25 = vpop.eup %2673 }
 0x39f   : > { %v2676_v26 = vpop.eup %2675  ;;  %v1502_v27 = vsel %vm1170_vm2, %v2674_v25, 0.0 }
 0x3a0   : > { %1503 = vadd.xlane.f32.xlu0 %v1502_v27  ;;  %v1505_v28 = vsel %vm1170_vm2, %v2676_v26, 0.0 }
 0x3a1   : > { %1506 = vadd.xlane.f32.xlu1 %v1505_v28 }
 0x3a2   : > { %v2678_v29 = vpop.eup %2677 }
 0x3a3   : > { %v1508_v30 = vsel %vm1170_vm2, %v2678_v29, 0.0 }
 0x3a4   : > { %1509 = vadd.xlane.f32.xlu0 %v1508_v30 }
 0x3b2   : > { %1031 = vrot.lane.b32.xlu1 %v729_v10, %s2967_s14 }
 0x3ba   : > { %1028 = vrot.lane.b32.xlu0 %v729_v10, %s2969_s18 }
 0x429   : > { %v1501_v32 = vpop.xlane.xlu1 %1500 }
 0x42a   : > { %2679 = vrcp.f32 %v1501_v32 }
 0x42d   : > { %v1504_v33 = vpop.xlane.xlu0 %1503 }
 0x42e   : > { %v1507_v34 = vpop.xlane.xlu1 %1506  ;;  %2681 = vrcp.f32 %v1504_v33 }
 0x42f   : > { %2683 = vrcp.f32 %v1507_v34 }
 0x431   : > { %v1510_v35 = vpop.xlane.xlu0 %1509 }
 0x432   : > { %v1032_v36 = vpop.permute.xlu1 %1031  ;;  %2685 = vrcp.f32 %v1510_v35 }
 0x433   : > { %v1050_v38 = vcombine.low %v1026_v31, %v1032_v36  ;;  %v1051_v39 = vcombine.high %v1026_v31, %v1032_v36 }
 0x434   : > { %v2680_v37 = vpop.eup %2679 }
 0x435   : > { %v1515_v40 = vmul.f32 %v2680_v37, %v2672_v23  ;;  %v1029_v42 = vpop.permute.xlu0 %1028  ;;  %v1058_v46 = vrot.slane %v1050_v38, %v3319_v41  ;;  %v1065_v47 = vrot.slane %v1051_v39, %v3319_v41 }
 0x436   : > { %v1034_v43 = vcombine.low %v729_v10, %v1029_v42  ;;  %v1035_v44 = vcombine.high %v729_v10, %v1029_v42 }
 0x437   : > { %1519 = vst.msk [vmem:[%s3390_s20] sm:$0xff] %vm1170_vm2, %v1515_v40 }
 0x438   : > { %v2682_v45 = vpop.eup %2681  ;;  %v1042_v49 = vrot.slane %v1034_v43, %v3319_v41  ;;  %v1049_v50 = vrot.slane %v1035_v44, %v3319_v41 }
 0x439   : > { %v2684_v51 = vpop.eup %2683  ;;  %v1516_v52 = vmul.f32 %v2682_v45, %v2674_v25 }
 0x43a   : > { %v1517_v53 = vmul.f32 %v2684_v51, %v2676_v26  ;;  %v1066_v54 = vcombine.low %v1042_v49, %v1058_v46  ;;  %v1067_v55 = vcombine.high %v1042_v49, %v1058_v46  ;;  %v1082_v56 = vcombine.low %v1049_v50, %v1065_v47 }
 0x43b   : > { %1520 = vst.msk [vmem:[%s3390_s20 + $0x8] sm:$0xff] %vm1170_vm2, %v1516_v52  ;;  %v1083_v57 = vcombine.high %v1049_v50, %v1065_v47 }
 0x43c   : > { %v2686_v58 = vpop.eup %2685  ;;  %1521 = vst.msk [vmem:[%s3390_s20 + $0x10] sm:$0xff] %vm1170_vm2, %v1517_v53  ;;  %v1074_v59 = vrot.slane %v1066_v54, %v3321_v48  ;;  %v1081_v60 = vrot.slane %v1067_v55, %v3321_v48  ;;  %v1090_v61 = vrot.slane %v1082_v56, %v3321_v48 }
 0x43d   : > { %v1518_v62 = vmul.f32 %v2686_v58, %v2678_v29  ;;  %v1097_v63 = vrot.slane %v1083_v57, %v3321_v48 }
 0x43e   : > { %v1102_v0 = vcombine.low %v1074_v59, %v1081_v60  ;;  %v2384_v2 = vcombine.high %v1074_v59, %v1081_v60 }
 0x43f   : > { %1522 = vst.msk [vmem:[%s3390_s20 + $0x18] sm:$0xff] %vm1170_vm2, %v1518_v62  ;;  %v1118_v3 = vcombine.low %v1090_v61, %v1097_v63  ;;  %v2385_v4 = vcombine.high %v1090_v61, %v1097_v63 }
 0x440   : > { %v1109_v5 = vrot.slane %v1102_v0, %v3319_v41  ;;  %v1117_v6 = vrot.slane %v2384_v2, %v3319_v41 }
 0x441   : > { %v1125_v7 = vrot.slane %v1118_v3, %v3319_v41  ;;  %v1133_v8 = vrot.slane %v2385_v4, %v3319_v41 }
 0x442   : > { %v1134_v9 = vcombine.low %v1109_v5, %v1117_v6  ;;  %v1135_v10 = vcombine.high %v1109_v5, %v1117_v6 }
 0x443   : > { %v1150_v11 = vcombine.low %v1125_v7, %v1133_v8  ;;  %v1151_v12 = vcombine.high %v1125_v7, %v1133_v8 }
 0x444   : > { %v1142_v13 = vrot.slane %v1134_v9, %v3321_v48  ;;  %v1149_v15 = vrot.slane %v1135_v10, %v3321_v48 }
 0x445   : > { %v1158_v14 = vrot.slane %v1150_v11, %v3321_v48  ;;  %v1165_v16 = vrot.slane %v1151_v12, %v3321_v48  ;;  %v1816_v48 = vld [vmem:[#allocation10 + $0x8] sm:$0xff] }
 0x447   : > { %v1166_v17 = vcombine.low %v1142_v13, %v1158_v14  ;;  %v1167_v18 = vcombine.high %v1142_v13, %v1158_v14  ;;  %v1168_v41 = vcombine.low %v1149_v15, %v1165_v16  ;;  %v1169_v19 = vcombine.high %v1149_v15, %v1165_v16 }
 0x449   : > { %2504 = vmatpush3.msra.mxu0 %v1166_v17  ;;  %2509 = vmatpush3.msra.mxu1 %v1167_v18 }
 0x44a   : > { %2506 = vmatmul.mubr.msk.f32.vlgmr.msra.gmra.mrb[6].mxu0 %vm1170_vm2, %v1515_v40  ;;  %2511 = vmatmul.mubr.msk.f32.vlgmr.msra.gmra.mrb[8].mxu1 %vm1170_vm2, %v1516_v52 }
 0x44b   : > { %2513 = vmatprep.subr.mxu0 %v2966_v1  ;;  %2518 = vmatprep.subr.mxu1 %v2966_v1 }
 0x44c   : > { %2514 = vmatpush3.msra.mxu0 %v1168_v41  ;;  %2519 = vmatpush3.msra.mxu1 %v1169_v19 }
 0x44d   : > { %2515 = vmatprep.mubr.msk.f32.mxu0 %vm2965_vm0, %v2966_v1  ;;  %2520 = vmatprep.mubr.msk.f32.mxu1 %vm2965_vm0, %v2966_v1 }
 0x44e   : > { %2516 = vmatmul.mubr.msk.f32.vlgmr.msra.gmra.mrb[8].mxu0 %vm1170_vm2, %v1517_v53  ;;  %2521 = vmatmul.mubr.msk.f32.vlgmr.msra.gmra.mrb[10].mxu1 %vm1170_vm2, %v1518_v62 }
 0x44f   : > { %2523 = vmatprep.subr.mxu0 %v2966_v1  ;;  %2528 = vmatprep.subr.mxu1 %v2966_v1 }
 0x450   : > { %2525 = vmatprep.mubr.msk.f32.mxu0 %vm2965_vm0, %v2966_v1  ;;  %2530 = vmatprep.mubr.msk.f32.mxu1 %vm2965_vm0, %v2966_v1 }
 0x451   : > { %2524 = vmatpush3.msra.mxu0 %v1816_v48  ;;  %2529 = vmatpush3.msra.mxu1 %v1815_v20 }
 0x452   : > { %2533 = vmatprep.subr.mxu0 %v2966_v1  ;;  %2538 = vmatprep.subr.mxu1 %v2966_v1 }
 0x51d   : > { %v1592_v22 = vpop.f32.mrb[6].mxu0  ;;  %v1665_v23 = vpop.f32.mrb[8].mxu1 }
 0x51e   : > { %v2507_v25 = vpop.f32.mrb[7].mxu0  ;;  %v2512_v26 = vpop.f32.mrb[9].mxu1  ;;  %2526 = vmatmul.mubr.msk.f32.vlgmr.msra.gmra.mrb[10].mxu0 %vm1170_vm2, %v1665_v23  ;;  %2531 = vmatmul.mubr.msk.f32.vlgmr.msra.gmra.mrb[12].mxu1 %vm1170_vm2, %v1592_v22 }
 0x51f   : > { %2534 = vmatpush3.msra.mxu0 %v1963_v21  ;;  %2535 = vmatprep.mubr.msk.f32.mxu0 %vm2965_vm0, %v2966_v1 }
 0x520   : > { %2539 = vmatpush3.msra.mxu1 %v2038_v24  ;;  %2540 = vmatprep.mubr.msk.f32.mxu1 %vm2965_vm0, %v2966_v1 }
 0x521   : > { %v1738_v27 = vpop.f32.mrb[8].mxu0  ;;  %v1811_v28 = vpop.f32.mrb[10].mxu1 }
 0x522   : > { %v2517_v29 = vpop.f32.mrb[9].mxu0  ;;  %v2522_v30 = vpop.f32.mrb[11].mxu1  ;;  %2536 = vmatmul.mubr.msk.f32.vlgmr.msra.gmra.mrb[12].mxu0 %vm1170_vm2, %v1738_v27  ;;  %2541 = vmatmul.mubr.msk.f32.vlgmr.msra.gmra.mrb[14].mxu1 %vm1170_vm2, %v1811_v28 }
 0x523   : > { %2846 = shalt.err (!%p2843_p8)
}
 0x524   : > { %s2847_s1 = scalar_lea.hbm %s3447_s15, 512  ;;  %s2851_s23 = scalar_lea.hbm %s3541_s8, 1024 }
 0x525   : > { %p2848_p0 = scmp.ne.s32.totalorder %s3447_s15, %s2847_s1  ;;  %p2852_p7 = scmp.lt.u32.totalorder %s3447_s15, %s3541_s8 }
 0x526   : > { %p2853_p13 = scmp.lt.u32.totalorder %s2851_s23, %s2847_s1  ;;  %p2855_p2 = scmp.lt.u32.totalorder %s2847_s1, %s3447_s15 }
 0x527   : > { %p2849_p5 = pnand %p2848_p0, %p3595_p4 }
 0x528   : > { %p2854_p9 = por %p2853_p13, %p2852_p7 }
 0x529   : > { %p2850_p12 = pneg %p2849_p5 }
 0x52a   : > { %p2856_p1 = por %p2855_p2, %p2854_p9 }
 0x52c   : > { %p2857_p3 = pnand %p2856_p1, %p2850_p12 }
 0x52e   : > { %2860 = shalt.err (!%p2857_p3)
}
 0x52f   : > { %s2973_s26 = smov 128   ;;  %s2974_s17 = smov 8   ;;  %v2402_v40 = vld [vmem:[%s3539_s6] ss:$0 sm:$0xff] }
 0x530   : > { %2576 = dma.vmem_to_hbm [thread:$0]  (%p3595_p4), %s3449_s9, 512, %s3447_s15, %s2128_s21, %s2973_s26, %s2973_s26, %s2974_s17  }
 0x531   : > { %s2405_s4 = sshll.u32 %s2947_s30, 7  ;;  %s466_s10 = scalar_lea.vmem [#allocation11], %s3269_s19 }
 0x532   : > { %s2141_s22 = sshll.u32 %s466_s10, 4  ;;  %s3483_s21 = scalar_lea.hbm %s3540_s7, %s2405_s4  ;;  %s3485_s22 = int_to_ptr.vmem [resolvable:$true] %s2141_s22 }
 0x533   : > { %s2123_s27 = scalar_lea.sflag [#allocation4], %s3266_s3  ;;  %s2861_s11 = scalar_lea.vmem %s3485_s22, 128 }
 0x534   : > { %p2862_p11 = scmp.ne.s32.totalorder %s3485_s22, %s2861_s11  ;;  %s2975_s30 = smov [#allocation11]  }
 0x535   : > { %s2865_s19 = sshll.u32 %s2975_s30, 4  ;;  %s2866_s19 = int_to_ptr.vmem [resolvable:$false] %s2865_s19 }
 0x536   : > { %p2863_p10 = pnand %p2862_p11, %p3595_p4  ;;  %s2867_s13 = scalar_lea.vmem %s2866_s19, 256 }
 0x537   : > { %p2868_p8 = scmp.lt.s32.totalorder %s3485_s22, %s2866_s19  ;;  %p2869_p0 = scmp.lt.s32.totalorder %s2867_s13, %s2861_s11 }
 0x538   : > { %p2864_p6 = pneg %p2863_p10 }
 0x539   : > { %p2870_p5 = por %p2869_p0, %p2868_p8 }
 0x53b   : > { %p2871_p12 = pnand %p2870_p5, %p2864_p6 }
 0x5f1   : > { %v1886_v1 = vpop.f32.mrb[10].mxu0  ;;  %v1959_v31 = vpop.f32.mrb[12].mxu1 }
 0x5f2   : > { %v1960_v32 = vadd.f32 %v1959_v31, %v1886_v1  ;;  %v2527_v33 = vpop.f32.mrb[11].mxu0  ;;  %v2532_v34 = vpop.f32.mrb[13].mxu1 }
 0x5f5   : > { %v2033_v35 = vpop.f32.mrb[12].mxu0  ;;  %v2108_v36 = vpop.f32.mrb[14].mxu1 }
 0x5f6   : > { %v2037_v37 = vadd.f32 %v2033_v35, %v1960_v32  ;;  %v2537_v38 = vpop.f32.mrb[13].mxu0  ;;  %v2542_v39 = vpop.f32.mrb[15].mxu1 }
 0x5f8   : > { %v2112_v42 = vadd.f32 %v2108_v36, %v2037_v37 }
 0x5fa   : > { %v2120_v43 = vadd.f32 %v2402_v40, %v2112_v42 }
 0x5fc   : > { %2121 = vst.msk [vmem:[%s466_s10] sm:$0xff] %vm492_vm1, %v2120_v43 }
 0x5fd   : > { %2874 = shalt.err (!%p2871_p12)
}
 0x5fe   : > { %s2875_s3 = scalar_lea.hbm %s3483_s21, 128  ;;  %s2879_s14 = scalar_lea.hbm %s3540_s7, 256 }
 0x5ff   : > { %p2876_p7 = scmp.ne.s32.totalorder %s3483_s21, %s2875_s3  ;;  %p2880_p2 = scmp.lt.u32.totalorder %s3483_s21, %s3540_s7 }
 0x600   : > { %p2881_p1 = scmp.lt.u32.totalorder %s2879_s14, %s2875_s3  ;;  %p2883_p11 = scmp.lt.u32.totalorder %s2875_s3, %s3483_s21 }
 0x601   : > { %p2877_p13 = pnand %p2876_p7, %p3595_p4 }
 0x602   : > { %p2882_p3 = por %p2881_p1, %p2880_p2 }
 0x603   : > { %p2878_p9 = pneg %p2877_p13 }
 0x604   : > { %p2884_p10 = por %p2883_p11, %p2882_p3 }
 0x606   : > { %p2885_p6 = pnand %p2884_p10, %p2878_p9 }
 0x608   : > { %2888 = shalt.err (!%p2885_p6)
}
 0x609   : > { %2575 = dma.vmem_to_hbm [thread:$0]  (%p3595_p4), %s3485_s22, 128, %s3483_s21, %s2123_s27  }
 0x60a PF: > { %s3596_s12 = sld [smem:[#allocation19_spill]]  ;;  %s3597_s26 = sld [smem:[#allocation22_spill]] }
 0x60b   : > { %s3598_s17 = sld [smem:[#allocation21_spill]] }
 0x610   : > { %s2171_s20 = sand.u32 1, %s3596_s12   ;;  %p3599_p8 = scmp.ne.s32.totalorder %s3597_s26, 0 }
 0x611   : > { %p3600_p0 = scmp.ge.s32.totalorder %s3598_s17, 2  ;;  %s2172_s16 = scalar_lea.sflag [#allocation4], %s2171_s20 }
 0x613   : > { %p2597_p5 = pnand %p3600_p0, %p3599_p8 }
 0x615   : > { %2926 = dma.done.wait (!%p2597_p5), %s2172_s16, 128  }
 0x616   : > { %2928 = vsyncadd (!%p2597_p5), %s2172_s16, 4294967168  ;;  %s2181_s4 = scalar_lea.sflag [#allocation13], %s2171_s20 }
 0x617   : > { %2930 = dma.done.wait (!%p2597_p5), %s2181_s4, 512  }
 0x618   : > { %2932 = vsyncadd (!%p2597_p5), %s2181_s4, 4294966784  ;;  %s32_s10 = sadd.s32 1, %s3598_s17   ;;  %s3601_s24 = sld [smem:[#allocation24_spill]] }
 0x619   : > { %p29_p12 = scmp.ge.s32.totalorder %s32_s10, 4   ;;  %s3602_s30 = sld [smem:[#allocation20_spill]] }
 0x61a   : > { %s3603_s9 = sld [smem:[#allocation23_spill]]  ;;  %s3604_s27 = smov %s2939_s28 }
 0x61b   : > { %s3605_s28 = smov %s2943_s29  ;;  %31 = sbr.rel (!%p29_p12) target bundleno = 15 (0xf), region = 149 }
 0x61e   : > { %s3606_s29 = smov %s3601_s24 }
 0x622   :  { %2186 = vsyncpa [#allocation3], 1 }
 0x623   :  { %2188 = vsyncpa [#allocation3 + $0x1], 1 }
 0x624   :  { %2189 = vsyncpa [#allocation6], 1 }
 0x625   :  { %2191 = vsyncpa [#allocation6 + $0x1], 1 }
 0x626   :  { %2192 = vsyncpa [#allocation9], 1 }
 0x627   :  { %2193 = vsyncpa [#allocation4], 1 }
 0x628   :  { %2195 = vsyncpa [#allocation4 + $0x1], 1 }
 0x629   :  { %2196 = vsyncpa [#allocation13], 1 }
 0x62a   :  { %2198 = vsyncpa [#allocation13 + $0x1], 1 }

</bundles_post_ra>
